<compile_context>
chip_gen: v7x
topology: tpu7x:2x2x1
jax: 0.10.0
libtpu: 0.0.40
codegen_flags: <defaults>
</compile_context>

<pallas_src>
import functools

import jax
import jax.numpy as jnp
import numpy as np
from jax import lax
from jax.experimental import pallas as pl
from jax.experimental.pallas import tpu as pltpu

EPS_ATTN = 1e-6  # Attention.eps

# Safe on all generations: > v5e's 16 MiB scoped default, < v7x's 64 MiB
# physical VMEM.  Only an upper bound -- nothing is reserved up-front.
_VMEM_LIMIT_BYTES = 48 * 1024 * 1024


def _round_up(x, m):
    return ((x + m - 1) // m) * m


def _pick_tile(n, tn_max):
    """Largest multiple of 128 <= tn_max that divides n; else the whole n."""
    if n <= tn_max:
        return n
    t = (tn_max // 128) * 128
    while t >= 128:
        if n % t == 0:
            return t
        t -= 128
    return n  # TODO(synk): masked tail tiles not implemented


def _pack_weights(params, chans):
    """Fold BN'd convblk into the attention convs and pack 8-aligned row groups.

    KV pack (pass 1):  rows = [ V (cout) | ones-bias | 0pad ... | K (cq) | 0pad ]
    FQ pack (pass 2):  rows = [ feat (cout) | 0pad ... | Q (cq) | 0pad ]
    """
    wc, bc, wq, bq, wk, bk, wv, bv, gamma = params
    cin = int(sum(chans))
    cout = int(wc.shape[1])
    cq = int(wq.shape[1])
    f32 = jnp.float32

    wc_m = jnp.asarray(wc, f32).T                      # (cout, cin)
    bc_v = jnp.asarray(bc, f32).reshape(cout)
    wq_m = jnp.asarray(wq, f32).T
    bq_v = jnp.asarray(bq, f32).reshape(-1)
    wk_m = jnp.asarray(wk, f32).T
    bk_v = jnp.asarray(bk, f32).reshape(-1)
    wv_m = jnp.asarray(wv, f32).T
    bv_v = jnp.asarray(bv, f32).reshape(-1)

    # fold convblk into the attention convs (applied directly to x).
    wqf = wq_m @ wc_m
    bqf = wq_m @ bc_v + bq_v
    wkf = wk_m @ wc_m
    bkf = wk_m @ bc_v + bk_v
    wvf = wv_m @ wc_m
    bvf = wv_m @ bc_v + bv_v

    cout_p = _round_up(cout, 8)
    cq_p = _round_up(cq + 1, 8)       # +1 spare row carries the "ones" channel
    cv_p = _round_up(cout + 1, 8)     # +1 spare row carries the "ones" channel
    rows_kv = cv_p + cq_p
    rows_fq = cout_p + cq_p

    w_kv = jnp.zeros((rows_kv, cin), f32)
    w_kv = w_kv.at[:cout].set(wvf).at[cv_p:cv_p + cq].set(wkf)
    b_kv = jnp.zeros((rows_kv,), f32)
    b_kv = (b_kv.at[:cout].set(bvf)
                 .at[cout].set(1.0)                 # ones row in the V group
                 .at[cv_p:cv_p + cq].set(bkf))

    w_fq = jnp.zeros((rows_fq, cin), f32)
    w_fq = w_fq.at[:cout].set(wc_m).at[cout_p:cout_p + cq].set(wqf)
    b_fq = jnp.zeros((rows_fq,), f32)
    b_fq = b_fq.at[:cout].set(bc_v).at[cout_p:cout_p + cq].set(bqf)

    offs = np.cumsum([0] + list(chans))
    w_kv_parts = [w_kv[:, int(offs[i]):int(offs[i + 1])].astype(jnp.bfloat16)
                  for i in range(len(chans))]
    w_fq_parts = [w_fq[:, int(offs[i]):int(offs[i + 1])].astype(jnp.bfloat16)
                  for i in range(len(chans))]

    # Attention.eps is added to sum_n(Kn) before the Q contraction; restrict it
    # to the real K rows (the ones/pad rows must stay exact).
    eps_add = np.zeros((cq_p, cv_p), np.float32)
    eps_add[:cq, cout] = EPS_ATTN
    eps_add = jnp.asarray(eps_add)

    gamma_sm = jnp.asarray(gamma, f32).reshape(1, 1)

    dims = dict(cin=cin, cout=cout, cq=cq, cout_p=cout_p, cq_p=cq_p,
                cv_p=cv_p, rows_kv=rows_kv, rows_fq=rows_fq)
    return (w_kv_parts, b_kv.reshape(rows_kv, 1),
            w_fq_parts, b_fq.reshape(rows_fq, 1),
            eps_add, gamma_sm, dims)


def _reduce_kernel(*refs, n_inputs, cq, cv_p):
    """Pass 1: accumulate the fused stats block over the N tiles of one batch.

    stats[m, c] = sum_n kn_aug[m, n] * v_aug[c, n]
      rows m <  cq : matrix[m, c] (c < cout),  k_sum[m] (c == cout)
      row  m == cq : value_sum[c] (c < cout),  N       (c == cout)
    """
    x_refs = refs[:n_inputs]
    w_refs = refs[n_inputs:2 * n_inputs]
    b_ref = refs[2 * n_inputs]
    stats_ref = refs[2 * n_inputs + 1]

    # one packed matmul straight from x (convblk folded into the weights).
    big = b_ref[...]                                                  # f32
    for x_ref, w_ref in zip(x_refs, w_refs):
        big = big + jnp.dot(w_ref[...], x_ref[0],
                            preferred_element_type=jnp.float32)       # (rows, TN)

    v_aug = big[:cv_p]            # (cv_p, TN): [V | ones | zeros]  (aligned slice)
    k = big[cv_p:]                # (cq_p, TN): [K | zeros]         (aligned slice)

    # l2-normalize K over channels; inject the ones row *after* normalization
    # so it doesn't perturb the norm but folds value_sum/N into the matmul.
    kn = k * lax.rsqrt(jnp.sum(k * k, axis=0, keepdims=True))
    row = lax.broadcasted_iota(jnp.int32, kn.shape, 0)
    kn_aug = jnp.where(row == cq, 1.0, kn)

    part = lax.dot_general(kn_aug, v_aug, (((1,), (1,)), ((), ())),
                           preferred_element_type=jnp.float32)        # (cq_p, cv_p)

    @pl.when(pl.program_id(1) == 0)
    def _():
        stats_ref[...] = jnp.zeros_like(stats_ref)

    stats_ref[0] += part


def _apply_kernel(*refs, n_inputs, cout, cout_p, cq):
    """Pass 2: recompute feat/Q for this N tile and apply the attention."""
    stats_ref = refs[0]
    x_refs = refs[1:1 + n_inputs]
    w_refs = refs[1 + n_inputs:1 + 2 * n_inputs]
    b_ref = refs[1 + 2 * n_inputs]
    gamma_ref = refs[2 + 2 * n_inputs]
    out_ref = refs[3 + 2 * n_inputs]

    big = b_ref[...]
    for x_ref, w_ref in zip(x_refs, w_refs):
        big = big + jnp.dot(w_ref[...], x_ref[0],
                            preferred_element_type=jnp.float32)       # (rows, TN)

    feat = big[:cout]             # (cout, TN)
    q = big[cout_p:]              # (cq_p, TN): [Q | zeros]  (aligned slice)

    qn = q * lax.rsqrt(jnp.sum(q * q, axis=0, keepdims=True))
    row = lax.broadcasted_iota(jnp.int32, qn.shape, 0)
    qn_aug = jnp.where(row == cq, 1.0, qn)

    # vsqm[c, n] = sum_m stats[m, c] * qn_aug[m, n]
    #   rows [:cout] -> value_sum[c] + qm[c, n]
    #   row  [cout]  -> H*W + sum_m qn[m, n] * (k_sum[m] + eps)   (tailor denom)
    stats = stats_ref[0]                                              # (cq_p, cv_p)
    vsqm = lax.dot_general(stats, qn_aug, (((0,), (0,)), ((), ())),
                           preferred_element_type=jnp.float32)        # (cv_p, TN)

    tailor = pl.reciprocal(vsqm[cout:cout + 1], approx=True)          # (1, TN)
    wv = vsqm[:cout] * tailor                                         # (cout, TN)

    gamma = gamma_ref[0, 0]                                           # SMEM scalar
    # feat * atten + feat  ==  feat * (gamma * weight_value + 1)
    out_ref[0] = feat * (gamma * wv + 1.0)


def feature_fusion_forward(x_list, params, *, tn_max=2048):
    """FeatureFusionModule forward.  x_list: list of NCHW arrays (the tensors
    that torch.cat(x, dim=1) would join).  params: BN-folded weights."""
    B, _, H, W = x_list[0].shape
    N = H * W
    chans = [int(xi.shape[1]) for xi in x_list]
    n_in = len(x_list)

    packed = _pack_weights(params, chans)
    w_kv_parts, b_kv, w_fq_parts, b_fq, eps_add, gamma_sm, d = packed
    cin, cout, cq = d["cin"], d["cout"], d["cq"]
    cout_p, cq_p, cv_p = d["cout_p"], d["cq_p"], d["cv_p"]
    rows_kv, rows_fq = d["rows_kv"], d["rows_fq"]

    TN = _pick_tile(N, tn_max)
    NT = N // TN

    # channels-first (B, C, N) views; bf16 MXU operands halve the HBM reads.
    x_cn = [xi.reshape(B, ci, N).astype(jnp.bfloat16)
            for xi, ci in zip(x_list, chans)]

    f32 = jnp.float32

    # ---- pass 1: reduce over N --------------------------------------------
    reduce_kernel = functools.partial(_reduce_kernel, n_inputs=n_in,
                                      cq=cq, cv_p=cv_p)
    cost_reduce = pl.CostEstimate(
        flops=B * N * (2 * rows_kv * cin + 2 * cq_p * cv_p + 4 * cq_p),
        transcendentals=B * N,
        bytes_accessed=(B * cin * N * 2 + B * cq_p * cv_p * 4
                        + n_in * rows_kv * cin * 2))
    stats = pl.pallas_call(
        reduce_kernel,
        out_shape=jax.ShapeDtypeStruct((B, cq_p, cv_p), f32),
        grid_spec=pltpu.PrefetchScalarGridSpec(
            num_scalar_prefetch=0,
            grid=(B, NT),
            in_specs=(
                [pl.BlockSpec((1, ci, TN), lambda b, t: (b, 0, t))
                 for ci in chans]
                + [pl.BlockSpec((rows_kv, ci), lambda b, t: (0, 0))
                   for ci in chans]
                + [pl.BlockSpec((rows_kv, 1), lambda b, t: (0, 0))]),
            out_specs=pl.BlockSpec((1, cq_p, cv_p), lambda b, t: (b, 0, 0)),
        ),
        compiler_params=pltpu.CompilerParams(
            dimension_semantics=("parallel", "arbitrary"),
            vmem_limit_bytes=_VMEM_LIMIT_BYTES),
        cost_estimate=cost_reduce,
    )(*x_cn, *w_kv_parts, b_kv)

    # Attention.eps on the k_sum column (exact w.r.t. the module semantics).
    stats = stats + eps_add[None]

    # ---- pass 2: apply ------------------------------------------------------
    apply_kernel = functools.partial(_apply_kernel, n_inputs=n_in,
                                     cout=cout, cout_p=cout_p, cq=cq)
    cost_apply = pl.CostEstimate(
        flops=B * N * (2 * rows_fq * cin + 2 * cq_p * cv_p + 6 * cout),
        transcendentals=2 * B * N,
        bytes_accessed=(B * cin * N * 2 + B * cout * N * 4
                        + B * cq_p * cv_p * 4 + n_in * rows_fq * cin * 2))
    out = pl.pallas_call(
        apply_kernel,
        out_shape=jax.ShapeDtypeStruct((B, cout, N), f32),
        grid_spec=pltpu.PrefetchScalarGridSpec(
            num_scalar_prefetch=0,
            grid=(B, NT),
            in_specs=(
                [pl.BlockSpec((1, cq_p, cv_p), lambda b, t: (b, 0, 0))]
                + [pl.BlockSpec((1, ci, TN), lambda b, t: (b, 0, t))
                   for ci in chans]
                + [pl.BlockSpec((rows_fq, ci), lambda b, t: (0, 0))
                   for ci in chans]
                + [pl.BlockSpec((rows_fq, 1), lambda b, t: (0, 0)),
                   pl.BlockSpec(memory_space=pltpu.MemorySpace.SMEM)]),
            out_specs=pl.BlockSpec((1, cout, TN), lambda b, t: (b, 0, t)),
        ),
        compiler_params=pltpu.CompilerParams(
            dimension_semantics=("parallel", "parallel"),
            vmem_limit_bytes=_VMEM_LIMIT_BYTES),
        cost_estimate=cost_apply,
    )(stats, *x_cn, *w_fq_parts, b_fq, gamma_sm)

    return out.reshape(B, cout, H, W)


def matched_reference(x_list, packed):
    """Pure-JAX transcription of the kernel math (bf16 operands, folded
    weights) -- tight-tolerance check of the Pallas implementation."""
    w_kv_parts, b_kv, w_fq_parts, b_fq, eps_add, gamma_sm, d = packed
    cout, cq, cout_p, cv_p = d["cout"], d["cq"], d["cout_p"], d["cv_p"]
    f32 = jnp.float32
    B, _, H, W = x_list[0].shape
    N = H * W
    x_cn = [x.reshape(B, x.shape[1], N).astype(jnp.bfloat16) for x in x_list]

    def big(parts, bias):
        acc = bias[None]
        for w, x in zip(parts, x_cn):
            acc = acc + jnp.einsum("rc,bcn->brn", w, x,
                                   preferred_element_type=f32)
        return acc

    big_kv = big(w_kv_parts, b_kv)
    v_aug = big_kv[:, :cv_p]
    k = big_kv[:, cv_p:]
    kn = k * lax.rsqrt(jnp.sum(k * k, axis=1, keepdims=True))
    row = jnp.arange(k.shape[1])[None, :, None]
    kn_aug = jnp.where(row == cq, 1.0, kn)
    stats = jnp.einsum("bmn,bcn->bmc", kn_aug, v_aug,
                       preferred_element_type=f32) + eps_add[None]

    big_fq = big(w_fq_parts, b_fq)
    feat = big_fq[:, :cout]
    q = big_fq[:, cout_p:]
    qn = q * lax.rsqrt(jnp.sum(q * q, axis=1, keepdims=True))
    qn_aug = jnp.where(row == cq, 1.0, qn)
    vsqm = jnp.einsum("bmc,bmn->bcn", stats, qn_aug,
                      preferred_element_type=f32)
    wv = vsqm[:, :cout] * (1.0 / vsqm[:, cout:cout + 1])
    out = feat * (gamma_sm.reshape(()) * wv + 1.0)
    return out.reshape(B, cout, H, W)


def reference(x_list, params):
    """Pure-JAX, all-f32 reference mirroring the PyTorch forward (NCHW)."""
    wc, bc, wq, bq, wk, bk, wv, bv, gamma = params
    fcat = jnp.concatenate(x_list, axis=1)                            # (B, Cin, H, W)
    B, Cin, H, W = fcat.shape
    N = H * W
    x = fcat.reshape(B, Cin, N)
    feat = jnp.einsum('io,bin->bon', wc, x) + bc.reshape(1, -1, 1)    # (B, Cout, N)
    Q = jnp.einsum('oc,bon->bcn', wq, feat) + bq.reshape(1, -1, 1)
    K = jnp.einsum('oc,bon->bcn', wk, feat) + bk.reshape(1, -1, 1)
    V = jnp.einsum('oc,bon->bcn', wv, feat) + bv.reshape(1, -1, 1)
    Qn = Q / jnp.linalg.norm(Q, axis=1, keepdims=True)
    Kn = K / jnp.linalg.norm(K, axis=1, keepdims=True)
    tailor = 1.0 / (N + jnp.einsum('bcn,bc->bn', Qn,
                                   jnp.sum(Kn, axis=-1) + EPS_ATTN))
    value_sum = jnp.sum(V, axis=-1, keepdims=True)                    # (B, Cout, 1)
    matrix = jnp.einsum('bmn,bcn->bmc', Kn, V)                        # (B, Cq, Cout)
    qm = jnp.einsum('bmn,bmc->bcn', Qn, matrix)                       # (B, Cout, N)
    weight_value = (value_sum + qm) * tailor[:, None, :]
    atten = jnp.reshape(gamma, ()) * weight_value
    feat_out = feat * atten + feat
    return feat_out.reshape(B, -1, H, W)


if __name__ == "__main__":
    B, H, W = 2, 16, 16
    c_half = 4                       # each input tensor has 4 channels
    in_chan = 2 * c_half             # concat -> 8
    out_chan = 8                     # divisible by scale=4
    cq = out_chan // 4

    key = jax.random.PRNGKey(0)
    ks = jax.random.split(key, 14)

    # inputs (list of two NCHW tensors, as `torch.cat(x, dim=1)` implies)
    x1 = jax.random.normal(ks[0], (B, c_half, H, W), jnp.float32)
    x2 = jax.random.normal(ks[1], (B, c_half, H, W), jnp.float32)

    # convblk = Conv2d(in_chan, out_chan, 1) + BatchNorm2d(out_chan), BN folded
    wc_raw = jax.random.normal(ks[2], (in_chan, out_chan), jnp.float32) * 0.3
    bc_raw = jax.random.normal(ks[3], (out_chan,), jnp.float32) * 0.1
    bn_w = 1.0 + 0.1 * jax.random.normal(ks[4], (out_chan,), jnp.float32)
    bn_b = 0.1 * jax.random.normal(ks[5], (out_chan,), jnp.float32)
    bn_mean = 0.05 * jax.random.normal(ks[6], (out_chan,), jnp.float32)
    bn_var = jnp.abs(jax.random.normal(ks[7], (out_chan,), jnp.float32)) + 0.5
    scale = bn_w / jnp.sqrt(bn_var + 1e-5)
    wc = wc_raw * scale[None, :]
    bc = (bc_raw * scale + bn_b - bn_mean * scale).reshape(1, out_chan)

    # Attention 1x1 convs
    wq = jax.random.normal(ks[8], (out_chan, cq), jnp.float32) * 0.3
    bq = (0.1 * jax.random.normal(ks[9], (cq,), jnp.float32)).reshape(1, cq)
    wk = jax.random.normal(ks[10], (out_chan, cq), jnp.float32) * 0.3
    bk = (0.1 * jax.random.normal(ks[11], (cq,), jnp.float32)).reshape(1, cq)
    wv = jax.random.normal(ks[12], (out_chan, out_chan), jnp.float32) * 0.3
    bv = (0.1 * jax.random.normal(ks[13], (out_chan,), jnp.float32)).reshape(1, out_chan)

    # PyTorch inits gamma=0 (attention branch identically zero); use a nonzero
    # deterministic value so the attention path is exercised.
    gamma = jnp.full((1, 1), 0.5, jnp.float32)

    params = (wc, bc, wq, bq, wk, bk, wv, bv, gamma)
    x_list = [x1, x2]
    chans = [c_half, c_half]

    out = feature_fusion_forward(x_list, params)
    out = jax.block_until_ready(out)

    # Tight check against a pure-JAX transcription of the kernel math
    # (same bf16 MXU operands and host-side weight folding).
    ref_match = matched_reference(x_list, _pack_weights(params, chans))
    np.testing.assert_allclose(np.asarray(out), np.asarray(ref_match),
                               rtol=5e-3, atol=5e-3)

    # Loose check against the all-f32 module-semantics reference; slack covers
    # the bf16 MXU operands, the folded weights and the approx EUP reciprocal.
    ref_f32 = reference(x_list, params)
    np.testing.assert_allclose(np.asarray(out), np.asarray(ref_f32),
                               rtol=5e-2, atol=5e-2)

    print("KERNEL_OK")
</pallas_src>

<mosaic_0001>
module attributes {stable_mosaic.version = 11 : i64} {
  func.func @_reduce_kernel(%arg0: i32, %arg1: i32, %arg2: memref<1x4x256xbf16, #tpu.memory_space<vmem>>, %arg3: memref<1x4x256xbf16, #tpu.memory_space<vmem>>, %arg4: memref<24x4xbf16, #tpu.memory_space<vmem>>, %arg5: memref<24x4xbf16, #tpu.memory_space<vmem>>, %arg6: memref<24x1xf32, #tpu.memory_space<vmem>>, %arg7: memref<1x8x16xf32, #tpu.memory_space<vmem>>) attributes {dimension_semantics = [#tpu.dimension_semantics<parallel>, #tpu.dimension_semantics<arbitrary>], iteration_bounds = array<i64: 2, 1>, scalar_prefetch = 0 : i64, scratch_operands = 0 : i64, tpu.core_type = #tpu.core_type<tc>, window_params = [{transform_indices = @transform_0, window_bounds = array<i64: 1, 4, 256>}, {transform_indices = @transform_1, window_bounds = array<i64: 1, 4, 256>}, {pipeline_mode = #tpu.pipeline_mode<synchronous>, transform_indices = @transform_2, window_bounds = array<i64: 24, 4>}, {pipeline_mode = #tpu.pipeline_mode<synchronous>, transform_indices = @transform_3, window_bounds = array<i64: 24, 4>}, {pipeline_mode = #tpu.pipeline_mode<synchronous>, transform_indices = @transform_4, window_bounds = array<i64: 24, 1>}, {transform_indices = @transform_5, window_bounds = array<i64: 1, 8, 16>}]} {
    %c0 = arith.constant 0 : index
    %c0_0 = arith.constant 0 : index
    %0 = vector.load %arg6[%c0, %c0_0] : memref<24x1xf32, #tpu.memory_space<vmem>>, vector<24x1xf32>
    %c0_1 = arith.constant 0 : index
    %c0_2 = arith.constant 0 : index
    %1 = vector.load %arg4[%c0_1, %c0_2] : memref<24x4xbf16, #tpu.memory_space<vmem>>, vector<24x4xbf16>
    %c0_3 = arith.constant 0 : index
    %c0_4 = arith.constant 0 : index
    %c0_5 = arith.constant 0 : index
    %2 = vector.load %arg2[%c0_3, %c0_4, %c0_5] : memref<1x4x256xbf16, #tpu.memory_space<vmem>>, vector<1x4x256xbf16>
    %3 = vector.shape_cast %2 : vector<1x4x256xbf16> to vector<4x256xbf16>
    %cst = arith.constant dense<0.000000e+00> : vector<24x256xf32>
    %4 = tpu.matmul %1, %3, %cst {dimension_numbers = #tpu.dot_dimension_numbers<[1], [0], [0], [1], [0, 0, 1, 1], [], []>} : vector<24x4xbf16>, vector<4x256xbf16>, vector<24x256xf32> -> vector<24x256xf32>
    %5 = vector.broadcast %0 : vector<24x1xf32> to vector<24x256xf32>
    %6 = arith.addf %5, %4 : vector<24x256xf32>
    %c0_6 = arith.constant 0 : index
    %c0_7 = arith.constant 0 : index
    %7 = vector.load %arg5[%c0_6, %c0_7] : memref<24x4xbf16, #tpu.memory_space<vmem>>, vector<24x4xbf16>
    %c0_8 = arith.constant 0 : index
    %c0_9 = arith.constant 0 : index
    %c0_10 = arith.constant 0 : index
    %8 = vector.load %arg3[%c0_8, %c0_9, %c0_10] : memref<1x4x256xbf16, #tpu.memory_space<vmem>>, vector<1x4x256xbf16>
    %9 = vector.shape_cast %8 : vector<1x4x256xbf16> to vector<4x256xbf16>
    %cst_11 = arith.constant dense<0.000000e+00> : vector<24x256xf32>
    %10 = tpu.matmul %7, %9, %cst_11 {dimension_numbers = #tpu.dot_dimension_numbers<[1], [0], [0], [1], [0, 0, 1, 1], [], []>} : vector<24x4xbf16>, vector<4x256xbf16>, vector<24x256xf32> -> vector<24x256xf32>
    %11 = arith.addf %6, %10 : vector<24x256xf32>
    %12 = vector.extract_strided_slice %11 {offsets = [0, 0], sizes = [16, 256], strides = [1, 1]} : vector<24x256xf32> to vector<16x256xf32>
    %13 = vector.extract_strided_slice %11 {offsets = [16, 0], sizes = [8, 256], strides = [1, 1]} : vector<24x256xf32> to vector<8x256xf32>
    %14 = arith.mulf %13, %13 : vector<8x256xf32>
    %cst_12 = arith.constant dense<0.000000e+00> : vector<256xf32>
    %15 = vector.multi_reduction <add>, %14, %cst_12 [0] : vector<8x256xf32> to vector<256xf32>
    %16 = vector.shape_cast %15 : vector<256xf32> to vector<1x256xf32>
    %17 = math.rsqrt %16 : vector<1x256xf32>
    %18 = vector.broadcast %17 : vector<1x256xf32> to vector<8x256xf32>
    %19 = arith.mulf %13, %18 : vector<8x256xf32>
    %20 = tpu.iota {dimensions = array<i32: 0>} : vector<8x256xi32>
    %c2_i32 = arith.constant 2 : i32
    %21 = vector.broadcast %c2_i32 : i32 to vector<8x256xi32>
    %22 = arith.cmpi eq, %20, %21 : vector<8x256xi32>
    %cst_13 = arith.constant 1.000000e+00 : f32
    %23 = vector.broadcast %cst_13 : f32 to vector<8x256xf32>
    %24 = arith.select %22, %23, %19 : vector<8x256xi1>, vector<8x256xf32>
    %cst_14 = arith.constant dense<0.000000e+00> : vector<8x16xf32>
    %25 = tpu.matmul %24, %12, %cst_14 {dimension_numbers = #tpu.dot_dimension_numbers<[1], [1], [0], [0], [0, 0, 1, 0], [], []>} : vector<8x256xf32>, vector<16x256xf32>, vector<8x16xf32> -> vector<8x16xf32>
    %c0_i32 = arith.constant 0 : i32
    %26 = arith.cmpi eq, %arg1, %c0_i32 : i32
    %27 = arith.extui %26 : i1 to i32
    %c0_i32_15 = arith.constant 0 : i32
    %28 = arith.cmpi ne, %27, %c0_i32_15 : i32
    scf.if %28 {
      %cst_22 = arith.constant 0.000000e+00 : f32
      %35 = vector.broadcast %cst_22 : f32 to vector<1x8x16xf32>
      %c0_23 = arith.constant 0 : index
      %c0_24 = arith.constant 0 : index
      %c0_25 = arith.constant 0 : index
      %36 = vector.load %arg7[%c0_23, %c0_24, %c0_25] : memref<1x8x16xf32, #tpu.memory_space<vmem>>, vector<1x8x16xf32>
      tpu.vector_store %arg7[%c0_23, %c0_24, %c0_25], %35 {strides = array<i32>} : memref<1x8x16xf32, #tpu.memory_space<vmem>>, vector<1x8x16xf32>,
    } else {
    }
    %c0_16 = arith.constant 0 : index
    %c0_17 = arith.constant 0 : index
    %c0_18 = arith.constant 0 : index
    %29 = vector.load %arg7[%c0_16, %c0_17, %c0_18] : memref<1x8x16xf32, #tpu.memory_space<vmem>>, vector<1x8x16xf32>
    %30 = vector.shape_cast %29 : vector<1x8x16xf32> to vector<8x16xf32>
    %31 = arith.addf %30, %25 : vector<8x16xf32>
    %c0_19 = arith.constant 0 : index
    %c0_20 = arith.constant 0 : index
    %c0_21 = arith.constant 0 : index
    %32 = vector.load %arg7[%c0_19, %c0_20, %c0_21] : memref<1x8x16xf32, #tpu.memory_space<vmem>>, vector<1x8x16xf32>
    %33 = vector.shape_cast %32 : vector<1x8x16xf32> to vector<8x16xf32>
    %34 = vector.shape_cast %31 : vector<8x16xf32> to vector<1x8x16xf32>
    tpu.vector_store %arg7[%c0_19, %c0_20, %c0_21], %34 {strides = array<i32>} : memref<1x8x16xf32, #tpu.memory_space<vmem>>, vector<1x8x16xf32>,
    return
  }
  func.func @transform_0(%arg0: i32, %arg1: i32) -> (i32, i32, i32) {
    %c0_i32 = arith.constant 0 : i32
    %c0_i32_0 = arith.constant 0 : i32
    return %arg0, %c0_i32, %arg1 : i32, i32, i32
  }
  func.func @transform_1(%arg0: i32, %arg1: i32) -> (i32, i32, i32) {
    %c0_i32 = arith.constant 0 : i32
    %c0_i32_0 = arith.constant 0 : i32
    return %arg0, %c0_i32, %arg1 : i32, i32, i32
  }
  func.func @transform_2(%arg0: i32, %arg1: i32) -> (i32, i32) {
    %c0_i32 = arith.constant 0 : i32
    %c0_i32_0 = arith.constant 0 : i32
    %c0_i32_1 = arith.constant 0 : i32
    return %c0_i32, %c0_i32_0 : i32, i32
  }
  func.func @transform_3(%arg0: i32, %arg1: i32) -> (i32, i32) {
    %c0_i32 = arith.constant 0 : i32
    %c0_i32_0 = arith.constant 0 : i32
    %c0_i32_1 = arith.constant 0 : i32
    return %c0_i32, %c0_i32_0 : i32, i32
  }
  func.func @transform_4(%arg0: i32, %arg1: i32) -> (i32, i32) {
    %c0_i32 = arith.constant 0 : i32
    %c0_i32_0 = arith.constant 0 : i32
    %c0_i32_1 = arith.constant 0 : i32
    return %c0_i32, %c0_i32_0 : i32, i32
  }
  func.func @transform_5(%arg0: i32, %arg1: i32) -> (i32, i32, i32) {
    %c0_i32 = arith.constant 0 : i32
    %c0_i32_0 = arith.constant 0 : i32
    %c0_i32_1 = arith.constant 0 : i32
    return %arg0, %c0_i32, %c0_i32_0 : i32, i32, i32
  }
}

</mosaic_0001>

<bundles_post_ra>
// kernel: tpu_custom_call.1
= control target key start
LH: loop header
LB: loop body
LE: loop exit
PB: predicated region body
PF: predicated region fallthrough
CT: control target
= control target key end

     0   :  { %10 = vsyncpa [#allocation3], 0  ;;  %s1056_s0 = inlined_call_operand.vmem [shape: bf16[2,4,256], index: 0, kind: input, shape index: {}]   ;;  %s1057_s1 = inlined_call_operand.vmem [shape: bf16[2,4,256], index: 1, kind: input, shape index: {}]   ;;  %s1058_s2 = inlined_call_operand.vmem [shape: bf16[24,4], index: 2, kind: input, shape index: {}]   ;;  %s1059_s3 = inlined_call_operand.vmem [shape: bf16[24,4], index: 3, kind: input, shape index: {}]   ;;  %s1060_s4 = inlined_call_operand.vmem [shape: f32[24,1], index: 4, kind: input, shape index: {}]   ;;  %s1061_s5 = inlined_call_operand.hbm [shape: f32[2,8,16], index: 5, kind: output, shape index: {}]  }
   0x1   :  { %12 = vsyncpa [#allocation3 + $0x1], 0  ;;  %s920_s18 = smov 0   ;;  %s922_s19 = smov 0  }
   0x2   :  { %s924_s20 = smov 0   ;;  %s926_s21 = smov 0  }
   0x3   :  { %s928_s22 = smov 0   ;;  %s930_s23 = smov 0  }
   0x4 LB: > { %s696_s24 = sadd.s32 4294967295, %s885_s23   ;;  %s697_s25 = sadd.s32 4294967294, %s885_s23   ;;  %s885_s23 = sphi %s930_s23, %s18_s23   ;;  %s881_s22 = sphi %s928_s22, %s1068_s22   ;;  %s877_s21 = sphi %s926_s21, %s1067_s21   ;;  %s873_s20 = sphi %s924_s20, %s1066_s20   ;;  %s869_s19 = sphi %s922_s19, %s1065_s19   ;;  %s865_s18 = sphi %s920_s18, %s1064_s18  }
   0x5   : > { %s30_s26 = sadd.s32 1, %s881_s22  ;;  %s156_s27 = sadd.s32 1, %s873_s20 }
   0x6   : > { %p32_p0 = scmp.ge.s32.totalorder %s30_s26, 2  ;;  %p166_p1 = scmp.ne.s32.totalorder %s873_s20, %s869_s19 }
   0x7   : > { %p167_p2 = scmp.eq.s32.totalorder %s696_s24, 1  ;;  %p172_p3 = scmp.ne.s32.totalorder %s869_s19, %s865_s18 }
   0x8   : > { %s1070_s26 = smov (%p32_p0, %s30_s26), 0  ;;  %p173_p5 = scmp.eq.s32.totalorder %s697_s25, 1 }
   0x9   : > { %p960_p4 = por %p167_p2, %p166_p1  ;;  %s153_s29 = ssub.s32 %s881_s22, %s1070_s26 }
   0xa   : > { %p700_p6 = scmp.ge.s32.totalorder %s885_s23, 1  ;;  %p154_p7 = scmp.eq.s32.totalorder %s153_s29, 0 }
   0xb   : > { %p967_p8 = por %p173_p5, %p172_p3  ;;  %p226_p9 = scmp.lt.s32.totalorder %s885_s23, 3 }
   0xc   : > { %s973_s6 = scalar_select %p154_p7, %s873_s20, %s156_s27  }
   0xd   : > { %p227_p10 = pnand %p700_p6, %p226_p9 }
   0xe   : > { %p268_p11 = scmp.lt.s32.totalorder (!%p227_p10), %s877_s21, 1  ;;  %v887_v0 = vmov (!%p227_p10), 0   ;;  %v290_v1 = vld [vmem:[%s1060_s4 + $0x10] sm:$0xff] (!%p227_p10)  ;;  %vm319_vm0 = vcmask (!%p227_p10), 1041408   ;;  %v288_v2 = vld [vmem:[%s1060_s4] sm:$0xff] (!%p227_p10)  ;;  %v289_v3 = vld [vmem:[%s1060_s4 + $0x8] sm:$0xff] (!%p227_p10)  ;;  %v506_v61 = vlaneseq (!%p227_p10) }
   0xf   : > { %230 = sbr.rel (%p227_p10) target bundleno = 515 (0x203), region = 40  ;;  %358 = vmatprep.mubr.bf16.mxu1 (!%p227_p10), %v887_v0  ;;  %463 = vmatprep.mubr.bf16.mxu0 (!%p227_p10), %v887_v0  ;;  %v799_v10 = vld [vmem:[%s1058_s2] sm:$0xff] (!%p227_p10)   ;;  %vm312_vm1 = vcmask (!%p227_p10), 31744   ;;  %v801_v12 = vld [vmem:[%s1058_s2 + $0x8] ss:$0 sps:$4 sm:$0xff] (!%p227_p10)   ;;  %s264_s14 = sand.u32 (!%p227_p10), 1, %s869_s19  }
  0x10   : > { %797 = vset.pattern.permute.xlu0 (!%p227_p10), %v887_v0  ;;  %798 = vset.pattern.permute.xlu1 (!%p227_p10), %v887_v0  ;;  %v800_v11 = vld [vmem:[%s1059_s3] sm:$0xff] (!%p227_p10)   ;;  %v802_v13 = vld [vmem:[%s1059_s3 + $0x8] ss:$0 sps:$4 sm:$0xff] (!%p227_p10)   ;;  %v507_v62 = vshrl.u32 (!%p227_p10), %v506_v61, 7  ;;  %s701_s15 = sshll.u32 (!%p227_p10), %s264_s14, 3  ;;  %vm585_vm3 = vcmask (!%p227_p10), 130048  }
  0x11   : > { %389 = vperm.xlu0 (!%p227_p10), %797, %v290_v1   ;;  %384 = vperm.xlu1 (!%p227_p10), %798, %v289_v3   ;;  %s266_s16 = scalar_lea.vmem (!%p227_p10), [#allocation2], %s701_s15 }
  0x12   : > { %vm508_vm2 = vcmp.eq.s32.totalorder (!%p227_p10), %v507_v62, 2  ;;  %s605_s24 = sshll.u32 (!%p227_p10), %s266_s16, 4  ;;  %s1011_s24 = int_to_ptr.vmem [resolvable:$true] %s605_s24 }
  0x13   : > { %s807_s8 = scalar_lea.vmem (!%p227_p10), %s1011_s24, 128 }
  0x14   : > { %p808_p12 = scmp.ne.s32.totalorder (!%p227_p10), %s1011_s24, %s807_s8 }
  0x15   : > { %379 = vperm.xlu0 (!%p227_p10), %797, %v288_v2  }
  0x16   : > { %s269_s7 = scalar_select %p268_p11, %s877_s21, 1 }
  0x17   : > { %p809_p13 = pnand %p808_p12, %p960_p4 }
  0x18   : > { %s722_s10 = sshll.u32 %s269_s7, 2  ;;  %s592_s7 = scalar_lea.sflag [#allocation3], %s264_s14 }
  0x19   : > { %s275_s17 = scalar_lea.vmem %s1056_s0, %s722_s10  ;;  %s285_s27 = scalar_lea.vmem %s1057_s1, %s722_s10 }
  0x1a   : > { %v708_v4 = vld.sshfl [vmem:[%s275_s17] sm:$0x33 pattern:$0x76325410]  ;;  %s719_s17 = sshll.u32 %s877_s21, 7  ;;  %p810_p0 = pneg %p809_p13 }
  0x1b   : > { %v311_v5 = vcombine.high %v708_v4, %v708_v4  ;;  %v714_v6 = vld.sshfl [vmem:[%s285_s27] sm:$0x33 pattern:$0x76325410]  ;;  %v321_v7 = vsel %vm319_vm0, %v708_v4, 0  ;;  %s1009_s29 = scalar_lea.hbm %s1061_s5, %s719_s17  ;;  %s889_s21 = smov [#allocation2]  }
  0x1c   : > { %v418_v8 = vcombine.high %v714_v6, %v714_v6  ;;  %v426_v9 = vsel %vm319_vm0, %v714_v6, 0  ;;  %s811_s9 = sshll.u32 %s889_s21, 4  ;;  %s812_s9 = int_to_ptr.vmem [resolvable:$false] %s811_s9 }
  0x1d   : > { %709 = vmatprep.subr.msk.bf16.mxu1 %vm319_vm0, %v311_v5  ;;  %v888_v5 = vmov 0.0   ;;  %s813_s10 = scalar_lea.vmem %s812_s9, 256  ;;  %p814_p1 = scmp.lt.s32.totalorder %s1011_s24, %s812_s9 }
  0x1e   : > { %715 = vmatprep.subr.msk.bf16.mxu0 %vm319_vm0, %v418_v8  ;;  %327 = vmatpush1.bf16.msra.mxu1 %v321_v7  ;;  %586 = vst.msk [vmem:[%s266_s16] sm:$0xff] %vm585_vm3, %v888_v5  ;;  %p815_p2 = scmp.lt.s32.totalorder %s813_s10, %s807_s8 }
  0x1f   : > { %432 = vmatpush1.bf16.msra.mxu0 %v426_v9 }
  0x20   : > { %p816_p3 = por %p815_p2, %p814_p1 }
  0x21   : > { %710 = vmatmul.mubr.msk.bf16.vlgmr.msra.gmra.mrb[0].mxu1 %vm312_vm1, %v799_v10 }
  0x22   : > { %716 = vmatmul.mubr.msk.bf16.vlgmr.msra.gmra.mrb[0].mxu0 %vm312_vm1, %v800_v11  ;;  %368 = vmatprep.mubr.bf16.mxu1 %v887_v0  ;;  %p817_p5 = pnand %p816_p3, %p810_p0 }
  0x23   : > { %473 = vmatprep.mubr.bf16.mxu0 %v887_v0 }
  0x25   : > { %v587_v6 = vld [vmem:[%s266_s16] sm:$0xff] }
  0x29   : > { %711 = vmatmul.mubr.msk.bf16.gmra.mrb[4].mxu1 %vm312_vm1, %v801_v12 }
  0x2a   : > { %717 = vmatmul.mubr.msk.bf16.gmra.mrb[4].mxu0 %vm312_vm1, %v802_v13 }
  0x90   : > { %v390_v14 = vpop.permute.xlu0 %389  ;;  %v385_v17 = vpop.permute.xlu1 %384 }
  0x94   : > { %v380_v15 = vpop.permute.xlu0 %379 }
  0xf4   : > { %v360_v16 = vpop.f32.mrb[0].mxu1 }
  0xf5   : > { %v392_v18 = vadd.f32 %v380_v15, %v360_v16  ;;  %v465_v19 = vpop.f32.mrb[0].mxu0  ;;  %v362_v20 = vpop.f32.mrb[1].mxu1 }
  0xf6   : > { %v393_v21 = vadd.f32 %v380_v15, %v362_v20  ;;  %v467_v22 = vpop.f32.mrb[1].mxu0  ;;  %v364_v23 = vpop.f32.mrb[2].mxu1 }
  0xf7   : > { %v482_v24 = vadd.f32 %v465_v19, %v392_v18  ;;  %v394_v25 = vadd.f32 %v385_v17, %v364_v23  ;;  %v469_v26 = vpop.f32.mrb[2].mxu0  ;;  %v366_v27 = vpop.f32.mrb[3].mxu1 }
  0xf8   : > { %v483_v28 = vadd.f32 %v467_v22, %v393_v21  ;;  %v395_v29 = vadd.f32 %v385_v17, %v366_v27  ;;  %v471_v30 = vpop.f32.mrb[3].mxu0 }
  0xf9   : > { %v484_v31 = vadd.f32 %v469_v26, %v394_v25 }
  0xfa   : > { %v485_v32 = vadd.f32 %v471_v30, %v395_v29 }
  0xfb   : > { %v726_v33 = vpack.c.bf16 %v484_v31, %v482_v24 }
  0xfc   : > { %v724_v34 = vpack.c.bf16 %v485_v32, %v483_v28  ;;  %v370_v35 = vpop.f32.mrb[4].mxu1 }
  0xfd   : > { %v396_v36 = vadd.f32 %v390_v14, %v370_v35  ;;  %v475_v37 = vpop.f32.mrb[4].mxu0  ;;  %v372_v38 = vpop.f32.mrb[5].mxu1 }
  0xfe   : > { %v397_v39 = vadd.f32 %v390_v14, %v372_v38  ;;  %v477_v40 = vpop.f32.mrb[5].mxu0  ;;  %v374_v41 = vpop.f32.mrb[6].mxu1  ;;  %725 = vmatprep.subr.bf16.mxu1 %v724_v34 }
  0xff   : > { %v486_v42 = vadd.f32 %v475_v37, %v396_v36  ;;  %v479_v43 = vpop.f32.mrb[6].mxu0  ;;  %v375_v44 = vpop.f32.mrb[7].mxu1  ;;  %727 = vmatpush1.bf16.xpose.msra.mxu1 %v726_v33 }
 0x100   : > { %v487_v45 = vadd.f32 %v477_v40, %v397_v39  ;;  %v480_v46 = vpop.f32.mrb[7].mxu0 }
 0x101   : > { %v488_v47 = vmul.f32 %v486_v42, %v486_v42 }
 0x102   : > { %v489_v48 = vmul.f32 %v487_v45, %v487_v45 }
 0x103   : > { %v490_v49 = vrot.slane %v488_v47, 4 }
 0x104   : > { %v496_v50 = vrot.slane %v489_v48, 4 }
 0x105   : > { %v491_v51 = vadd.f32 %v490_v49, %v488_v47 }
 0x106   : > { %v497_v52 = vadd.f32 %v496_v50, %v489_v48 }
 0x107   : > { %v492_v53 = vrot.slane %v491_v51, 2 }
 0x108   : > { %v498_v54 = vrot.slane %v497_v52, 2 }
 0x109   : > { %v493_v55 = vadd.f32 %v492_v53, %v491_v51 }
 0x10a   : > { %v499_v56 = vadd.f32 %v498_v54, %v497_v52 }
 0x10b   : > { %v494_v57 = vrot.slane %v493_v55, 1 }
 0x10c   : > { %v500_v58 = vrot.slane %v499_v56, 1 }
 0x10d   : > { %v495_v59 = vadd.f32 %v494_v57, %v493_v55 }
 0x10e   : > { %v501_v60 = vadd.f32 %v500_v58, %v499_v56 }
 0x10f   : > { %803 = vrsqrt.f32 %v495_v59 }
 0x110   : > { %805 = vrsqrt.f32 %v501_v60 }
 0x119   : > { %v804_v63 = vpop.eup %803 }
 0x11a   : > { %v806_v0 = vpop.eup %805  ;;  %v504_v1 = vmul.f32 %v804_v63, %v486_v42 }
 0x11b   : > { %v505_v2 = vmul.f32 %v806_v0, %v487_v45 }
 0x11c   : > { %v509_v4 = vsel %vm508_vm2, 1.0, %v504_v1 }
 0x11d   : > { %v510_v3 = vsel %vm508_vm2, 1.0, %v505_v2 }
 0x11e   : > { %575 = vmatprep.mubr.f32.mxu1 %v510_v3 }
 0x11f   : > { %576 = vmatmul.mubr.f32.vlgmr.msra.gmra.mrb[8].mxu1 %v509_v4 }
 0x1f2   : > { %v577_v7 = vpop.f32.mrb[8].mxu1 }
 0x1f3   : > { %v588_v8 = vadd.f32 %v587_v6, %v577_v7  ;;  %v579_v9 = vpop.f32.mrb[9].mxu1 }
 0x1f5   : > { %590 = vst.msk [vmem:[%s266_s16] sm:$0xff] %vm585_vm3, %v588_v8 }
 0x1f6   : > { %820 = shalt.err (!%p817_p5)
}
 0x1f7   : > { %s821_s11 = scalar_lea.hbm %s1009_s29, 128  ;;  %s825_s14 = scalar_lea.hbm %s1061_s5, 256 }
 0x1f8   : > { %p822_p6 = scmp.ne.s32.totalorder %s1009_s29, %s821_s11  ;;  %p826_p10 = scmp.lt.u32.totalorder %s1009_s29, %s1061_s5 }
 0x1f9   : > { %p827_p11 = scmp.lt.u32.totalorder %s825_s14, %s821_s11  ;;  %p829_p13 = scmp.lt.u32.totalorder %s821_s11, %s1009_s29 }
 0x1fa   : > { %p823_p7 = pnand %p822_p6, %p960_p4 }
 0x1fb   : > { %p828_p12 = por %p827_p11, %p826_p10 }
 0x1fc   : > { %p824_p9 = pneg %p823_p7 }
 0x1fd   : > { %p830_p0 = por %p829_p13, %p828_p12 }
 0x1ff   : > { %p831_p1 = pnand %p830_p0, %p824_p9 }
 0x201   : > { %834 = shalt.err (!%p831_p1)
}
 0x202   : > { %740 = dma.vmem_to_hbm [thread:$0]  (%p960_p4), %s1011_s24, 128, %s1009_s29, %s592_s7  }
 0x203 PF: > { %p746_p2 = scmp.ge.s32.totalorder %s885_s23, 2  ;;  %s617_s17 = sand.u32 1, %s865_s18  }
 0x204   : > { %s618_s25 = scalar_lea.sflag [#allocation3], %s617_s17 }
 0x205   : > { %p743_p3 = pnand %p746_p2, %p967_p8 }
 0x207   : > { %860 = dma.done.wait (!%p743_p3), %s618_s25, 128  }
 0x208   : > { %862 = vsyncadd (!%p743_p3), %s618_s25, 4294967168  ;;  %s18_s23 = sadd.s32 1, %s885_s23   ;;  %s1064_s18 = smov %s869_s19 }
 0x209   : > { %p15_p5 = scmp.ge.s32.totalorder %s18_s23, 4   ;;  %s1065_s19 = smov %s873_s20 }
 0x20a   : > { %s1066_s20 = smov %s973_s6  ;;  %s1067_s21 = smov %s881_s22 }
 0x20b   : > { %s1068_s22 = smov %s1070_s26  ;;  %17 = sbr.rel (!%p15_p5) target bundleno = 4 (0x4), region = 82 }
 0x212   :  { %623 = vsyncpa [#allocation3], 1 }
 0x213   :  { %625 = vsyncpa [#allocation3 + $0x1], 1 }

</bundles_post_ra>
